<compile_context>
chip_gen: v7x
topology: tpu7x:2x2x1
jax: 0.10.0
libtpu: 0.0.40
codegen_flags: <defaults>
</compile_context>

<pallas_src>
import math
import numpy as np
import jax
import jax.numpy as jnp
from jax.experimental import pallas as pl
from jax.experimental.pallas import tpu as pltpu


# ---------------------------------------------------------------------------
# Gaussian taps
# ---------------------------------------------------------------------------
def _gaussian_taps_1d(kernel_size: int, sigma: float):
    """1-D taps whose outer product equals the module's normalized 2-D kernel.

    get_gaussian_kernel() builds G[i,j] = c*exp(-((i-m)^2+(j-m)^2)/(2v)) and
    normalizes by sum(G).  Since G = c*g(i)*g(j) and sum(G) = c*(sum g)^2,
    the normalized 2-D kernel is exactly outer(g/sum(g), g/sum(g)).
    """
    coord = np.arange(kernel_size, dtype=np.float64)
    mean = (kernel_size - 1) / 2.0
    g = np.exp(-((coord - mean) ** 2) / (2.0 * float(sigma) ** 2))
    g = g / g.sum()
    return tuple(float(v) for v in g)           # compile-time Python floats


def gaussian_kernel_2d(kernel_size: int = 5, sigma: float = 2.0) -> jnp.ndarray:
    """Deterministic 2-D Gaussian weights, identical to get_gaussian_kernel().
    Used only by the pure-JAX reference below."""
    coord = jnp.arange(kernel_size, dtype=jnp.float32)
    mean = (kernel_size - 1) / 2.0
    variance = float(sigma) ** 2.0
    xg = jnp.tile(coord, (kernel_size, 1))      # x_grid
    yg = xg.T                                   # y_grid
    g = (1.0 / (2.0 * math.pi * variance)) * jnp.exp(
        -((xg - mean) ** 2 + (yg - mean) ** 2) / (2.0 * variance))
    return g / jnp.sum(g)                       # (K, K), sums to 1


# ---------------------------------------------------------------------------
# Pallas kernel
# ---------------------------------------------------------------------------
def _make_blur_kernel(K: int, H: int, W: int, taps):
    pad = (K - 1) // 2
    Hp, Wp = H + 2 * pad, W + 2 * pad

    def blur_kernel(x_ref, o_ref, pbuf):
        # x_ref : (B, H, W)   block of flattened (N*C) planes, VMEM
        # o_ref : (B, H, W)   output block, VMEM
        # pbuf  : (B, Hp, Wp) f32 zero-padded scratch, VMEM
        #
        # Build the zero-padded tile in VMEM (no HBM pad pass).  Re-zeroed
        # every step so the grid axis can safely be "parallel".
        pbuf[...] = jnp.zeros_like(pbuf)
        pbuf[:, pad:pad + H, pad:pad + W] = x_ref[...].astype(jnp.float32)

        xp = pbuf[...]                          # single load of the padded tile

        # Vertical separable pass: K sublane-shifted MACs -> (B, H, Wp)
        v = taps[0] * xp[:, 0:H, :]
        for ki in range(1, K):
            v = v + taps[ki] * xp[:, ki:ki + H, :]

        # Horizontal separable pass: K lane-shifted MACs -> (B, H, W)
        acc = taps[0] * v[:, :, 0:W]
        for kj in range(1, K):
            acc = acc + taps[kj] * v[:, :, kj:kj + W]

        o_ref[...] = acc.astype(o_ref.dtype)

    return blur_kernel


# ---------------------------------------------------------------------------
# Wrapper (= GaussianBlur.forward)
# ---------------------------------------------------------------------------
def gaussian_blur(x: jnp.ndarray, kernel_size: int = 5, sigma: float = 2.0,
                  block_planes: int | None = None):
    """Equivalent of GaussianBlur.forward(tensor, kernel_size) -> (blur, kernel_size)."""
    N, C, H, W = x.shape
    K = int(kernel_size)
    pad = (K - 1) // 2
    P = N * C
    taps = _gaussian_taps_1d(K, sigma)

    # Collapse (N, C) into a single plane axis (free reshape, no data movement).
    xr = x.reshape(P, H, W)

    # Planes per grid step: ~2 MiB of f32 planes per block, at least 1, at most
    # P, and keep >= 2 grid steps when possible so both v7x TensorCores get work.
    if block_planes is None:
        plane_bytes = H * W * 4
        B = max(1, min(P, (2 << 20) // max(plane_bytes, 1)))
        if P >= 2:
            B = min(B, -(-P // 2))              # ceil(P / 2)
    else:
        B = max(1, min(P, int(block_planes)))

    grid = (pl.cdiv(P, B),)
    Hp, Wp = H + 2 * pad, W + 2 * pad

    blurred = pl.pallas_call(
        _make_blur_kernel(K, H, W, taps),
        out_shape=jax.ShapeDtypeStruct((P, H, W), x.dtype),
        grid=grid,
        in_specs=[pl.BlockSpec((B, H, W), lambda i: (i, 0, 0))],
        out_specs=pl.BlockSpec((B, H, W), lambda i: (i, 0, 0)),
        scratch_shapes=[pltpu.VMEM((B, Hp, Wp), jnp.float32)],
        compiler_params=pltpu.CompilerParams(
            dimension_semantics=("parallel",)),
    )(xr)

    return blurred.reshape(N, C, H, W), kernel_size


# ---------------------------------------------------------------------------
# Pure-JAX reference (mirrors the PyTorch depthwise Conv2d)
# ---------------------------------------------------------------------------
def _reference_blur(x, kernel_size=5, sigma=2.0):
    N, C, H, W = x.shape
    K = kernel_size
    pad = (K - 1) // 2
    w2d = gaussian_kernel_2d(K, sigma)
    w = jnp.broadcast_to(w2d[None, None], (C, 1, K, K))     # OIHW depthwise
    return jax.lax.conv_general_dilated(
        x, w, window_strides=(1, 1), padding=[(pad, pad), (pad, pad)],
        dimension_numbers=("NCHW", "OIHW", "NCHW"), feature_group_count=C)


if __name__ == "__main__":
    key = jax.random.PRNGKey(0)
    # Module's get_gaussian_kernel defaults to channels=3 -> 3-channel input.
    x = jax.random.uniform(key, (2, 3, 16, 16), dtype=jnp.float32)

    blurred, ks = gaussian_blur(x, kernel_size=5)
    blurred = jax.block_until_ready(blurred)

    ref = jax.block_until_ready(_reference_blur(x, kernel_size=5))
    assert blurred.shape == x.shape and ks == 5
    assert jnp.allclose(blurred, ref, atol=1e-5, rtol=1e-5), "mismatch vs reference"

    print("KERNEL_OK")
</pallas_src>

<mosaic_0001>
module attributes {stable_mosaic.version = 11 : i64} {
  func.func @blur_kernel(%arg0: i32, %arg1: memref<3x16x16xf32, #tpu.memory_space<vmem>>, %arg2: memref<3x16x16xf32, #tpu.memory_space<vmem>>, %arg3: memref<3x20x20xf32, #tpu.memory_space<vmem>>) attributes {dimension_semantics = [#tpu.dimension_semantics<parallel>], iteration_bounds = array<i64: 2>, scalar_prefetch = 0 : i64, scratch_operands = 1 : i64, tpu.core_type = #tpu.core_type<tc>, window_params = [{transform_indices = @transform_0, window_bounds = array<i64: 3, 16, 16>}, {transform_indices = @transform_1, window_bounds = array<i64: 3, 16, 16>}]} {
    %cst = arith.constant 0.000000e+00 : f32
    %0 = vector.broadcast %cst : f32 to vector<3x20x20xf32>
    %c0 = arith.constant 0 : index
    %c0_0 = arith.constant 0 : index
    %c0_1 = arith.constant 0 : index
    %1 = vector.load %arg3[%c0, %c0_0, %c0_1] : memref<3x20x20xf32, #tpu.memory_space<vmem>>, vector<3x20x20xf32>
    tpu.vector_store %arg3[%c0, %c0_0, %c0_1], %0 {strides = array<i32>} : memref<3x20x20xf32, #tpu.memory_space<vmem>>, vector<3x20x20xf32>,
    %c0_2 = arith.constant 0 : index
    %c0_3 = arith.constant 0 : index
    %c0_4 = arith.constant 0 : index
    %2 = vector.load %arg1[%c0_2, %c0_3, %c0_4] : memref<3x16x16xf32, #tpu.memory_space<vmem>>, vector<3x16x16xf32>
    %c0_5 = arith.constant 0 : index
    %c2 = arith.constant 2 : index
    %c2_6 = arith.constant 2 : index
    %3 = vector.load %arg3[%c0_5, %c2, %c2_6] : memref<3x20x20xf32, #tpu.memory_space<vmem>>, vector<3x16x16xf32>
    tpu.vector_store %arg3[%c0_5, %c2, %c2_6], %2 {strides = array<i32>} : memref<3x20x20xf32, #tpu.memory_space<vmem>>, vector<3x16x16xf32>,
    %c0_7 = arith.constant 0 : index
    %c0_8 = arith.constant 0 : index
    %c0_9 = arith.constant 0 : index
    %4 = vector.load %arg3[%c0_7, %c0_8, %c0_9] : memref<3x20x20xf32, #tpu.memory_space<vmem>>, vector<3x20x20xf32>
    %5 = vector.extract_strided_slice %4 {offsets = [0, 0, 0], sizes = [3, 16, 20], strides = [1, 1, 1]} : vector<3x20x20xf32> to vector<3x16x20xf32>
    %cst_10 = arith.constant 0.152469143 : f32
    %6 = vector.broadcast %cst_10 : f32 to vector<3x16x20xf32>
    %7 = arith.mulf %6, %5 : vector<3x16x20xf32>
    %8 = vector.extract_strided_slice %4 {offsets = [0, 1, 0], sizes = [3, 16, 20], strides = [1, 1, 1]} : vector<3x20x20xf32> to vector<3x16x20xf32>
    %cst_11 = arith.constant 0.221841291 : f32
    %9 = vector.broadcast %cst_11 : f32 to vector<3x16x20xf32>
    %10 = arith.mulf %9, %8 : vector<3x16x20xf32>
    %11 = arith.addf %7, %10 : vector<3x16x20xf32>
    %12 = vector.extract_strided_slice %4 {offsets = [0, 2, 0], sizes = [3, 16, 20], strides = [1, 1, 1]} : vector<3x20x20xf32> to vector<3x16x20xf32>
    %cst_12 = arith.constant 0.251379132 : f32
    %13 = vector.broadcast %cst_12 : f32 to vector<3x16x20xf32>
    %14 = arith.mulf %13, %12 : vector<3x16x20xf32>
    %15 = arith.addf %11, %14 : vector<3x16x20xf32>
    %16 = vector.extract_strided_slice %4 {offsets = [0, 3, 0], sizes = [3, 16, 20], strides = [1, 1, 1]} : vector<3x20x20xf32> to vector<3x16x20xf32>
    %cst_13 = arith.constant 0.221841291 : f32
    %17 = vector.broadcast %cst_13 : f32 to vector<3x16x20xf32>
    %18 = arith.mulf %17, %16 : vector<3x16x20xf32>
    %19 = arith.addf %15, %18 : vector<3x16x20xf32>
    %20 = vector.extract_strided_slice %4 {offsets = [0, 4, 0], sizes = [3, 16, 20], strides = [1, 1, 1]} : vector<3x20x20xf32> to vector<3x16x20xf32>
    %cst_14 = arith.constant 0.152469143 : f32
    %21 = vector.broadcast %cst_14 : f32 to vector<3x16x20xf32>
    %22 = arith.mulf %21, %20 : vector<3x16x20xf32>
    %23 = arith.addf %19, %22 : vector<3x16x20xf32>
    %24 = vector.extract_strided_slice %23 {offsets = [0, 0, 0], sizes = [3, 16, 16], strides = [1, 1, 1]} : vector<3x16x20xf32> to vector<3x16x16xf32>
    %cst_15 = arith.constant 0.152469143 : f32
    %25 = vector.broadcast %cst_15 : f32 to vector<3x16x16xf32>
    %26 = arith.mulf %25, %24 : vector<3x16x16xf32>
    %27 = vector.extract_strided_slice %23 {offsets = [0, 0, 1], sizes = [3, 16, 16], strides = [1, 1, 1]} : vector<3x16x20xf32> to vector<3x16x16xf32>
    %cst_16 = arith.constant 0.221841291 : f32
    %28 = vector.broadcast %cst_16 : f32 to vector<3x16x16xf32>
    %29 = arith.mulf %28, %27 : vector<3x16x16xf32>
    %30 = arith.addf %26, %29 : vector<3x16x16xf32>
    %31 = vector.extract_strided_slice %23 {offsets = [0, 0, 2], sizes = [3, 16, 16], strides = [1, 1, 1]} : vector<3x16x20xf32> to vector<3x16x16xf32>
    %cst_17 = arith.constant 0.251379132 : f32
    %32 = vector.broadcast %cst_17 : f32 to vector<3x16x16xf32>
    %33 = arith.mulf %32, %31 : vector<3x16x16xf32>
    %34 = arith.addf %30, %33 : vector<3x16x16xf32>
    %35 = vector.extract_strided_slice %23 {offsets = [0, 0, 3], sizes = [3, 16, 16], strides = [1, 1, 1]} : vector<3x16x20xf32> to vector<3x16x16xf32>
    %cst_18 = arith.constant 0.221841291 : f32
    %36 = vector.broadcast %cst_18 : f32 to vector<3x16x16xf32>
    %37 = arith.mulf %36, %35 : vector<3x16x16xf32>
    %38 = arith.addf %34, %37 : vector<3x16x16xf32>
    %39 = vector.extract_strided_slice %23 {offsets = [0, 0, 4], sizes = [3, 16, 16], strides = [1, 1, 1]} : vector<3x16x20xf32> to vector<3x16x16xf32>
    %cst_19 = arith.constant 0.152469143 : f32
    %40 = vector.broadcast %cst_19 : f32 to vector<3x16x16xf32>
    %41 = arith.mulf %40, %39 : vector<3x16x16xf32>
    %42 = arith.addf %38, %41 : vector<3x16x16xf32>
    %c0_20 = arith.constant 0 : index
    %c0_21 = arith.constant 0 : index
    %c0_22 = arith.constant 0 : index
    %43 = vector.load %arg2[%c0_20, %c0_21, %c0_22] : memref<3x16x16xf32, #tpu.memory_space<vmem>>, vector<3x16x16xf32>
    tpu.vector_store %arg2[%c0_20, %c0_21, %c0_22], %42 {strides = array<i32>} : memref<3x16x16xf32, #tpu.memory_space<vmem>>, vector<3x16x16xf32>,
    return
  }
  func.func @transform_0(%arg0: i32) -> (i32, i32, i32) {
    %c0_i32 = arith.constant 0 : i32
    %c0_i32_0 = arith.constant 0 : i32
    %c0_i32_1 = arith.constant 0 : i32
    return %arg0, %c0_i32, %c0_i32_0 : i32, i32, i32
  }
  func.func @transform_1(%arg0: i32) -> (i32, i32, i32) {
    %c0_i32 = arith.constant 0 : i32
    %c0_i32_0 = arith.constant 0 : i32
    %c0_i32_1 = arith.constant 0 : i32
    return %arg0, %c0_i32, %c0_i32_0 : i32, i32, i32
  }
}

</mosaic_0001>

<bundles_post_ra>
// kernel: tpu_custom_call.1
= control target key start
LH: loop header
LB: loop body
LE: loop exit
PB: predicated region body
PF: predicated region fallthrough
CT: control target
= control target key end

     0   :  { %6 = vsyncpa [#allocation4], 0  ;;  %s1027_s0 = inlined_call_operand.hbm [shape: f32[6,16,16], index: 0, kind: input, shape index: {}]   ;;  %s1028_s1 = inlined_call_operand.hbm [shape: f32[6,16,16], index: 1, kind: output, shape index: {}]  }
   0x1   :  { %8 = vsyncpa [#allocation4 + $0x1], 0 }
   0x2   :  { %9 = vsyncpa [#allocation5], 0 }
   0x3   :  { %11 = vsyncpa [#allocation5 + $0x1], 0  ;;  %s782_s6 = smov 0   ;;  %s784_s7 = smov 0  }
   0x4   :  { %s786_s8 = smov 0   ;;  %s788_s9 = smov 0  }
   0x5 LB: > { %s803_s10 = sadd.s32 4294967295, %s758_s9   ;;  %s588_s11 = sadd.s32 4294967294, %s758_s9   ;;  %s758_s9 = sphi %s788_s9, %s1040_s9   ;;  %s754_s8 = sphi %s786_s8, %s1039_s8   ;;  %s750_s7 = sphi %s784_s7, %s1038_s7   ;;  %s746_s6 = sphi %s782_s6, %s1037_s6  }
   0x6   : > { %s807_s12 = sadd.s32 1, %s758_s9   ;;  %s24_s13 = sadd.s32 1, %s754_s8 }
   0x7   : > { %s21_s14 = ssub.s32 %s758_s9, %s807_s12  ;;  %p31_p0 = scmp.ne.s32.totalorder %s754_s8, %s750_s7 }
   0x8   : > { %p22_p1 = scmp.eq.s32.totalorder %s21_s14, 0  ;;  %p32_p2 = scmp.eq.s32.totalorder %s758_s9, 0 }
   0x9   : > { %p37_p3 = scmp.ne.s32.totalorder %s750_s7, %s746_s6  ;;  %p38_p4 = scmp.eq.s32.totalorder %s803_s10, 0 }
   0xa   : > { %s819_s15 = scalar_select %p22_p1, %s754_s8, %s24_s13  }
   0xb   : > { %p33_p5 = por %p32_p2, %p31_p0  ;;  %p821_p6 = por %p38_p4, %p37_p3 }
   0xc   : > { %p61_p7 = scmp.eq.s32.totalorder %s803_s10, 1  ;;  %p67_p8 = scmp.eq.s32.totalorder %s588_s11, 1 }
   0xd   : > { %p618_p10 = scmp.lt.s32.totalorder %s758_s9, 2  ;;  %s87_s19 = sand.u32 1, %s754_s8  }
   0xe   : > { %p828_p11 = por %p61_p7, %p31_p0  ;;  %p832_p12 = por %p67_p8, %p37_p3 }
   0xf   : > { %s602_s20 = smul.u32 768, %s758_s9  ;;  %p843_p13 = pnand %p618_p10, %p33_p5 }
  0x10   : > { %s1031_s17 = scalar_select %p828_p11, 1, 0 }
  0x11   : > { %s1032_s18 = scalar_select %p832_p12, 1, 0 }
  0x12   : > { %s604_s21 = smul.u32 48, %s87_s19  ;;  %s841_s24 = scalar_lea.hbm %s1027_s0, %s602_s20 }
  0x13   : > { %s849_s28 = scalar_lea.sflag [#allocation4], %s87_s19  ;;  %s662_s29 = scalar_lea.hbm %s841_s24, 768 }
  0x14   : > { %s91_s26 = scalar_lea.vmem [#allocation3], %s604_s21  ;;  %p663_p0 = scmp.ne.s32.totalorder %s841_s24, %s662_s29 }
  0x15   : > { %s99_s27 = sshll.u32 %s91_s26, 4  ;;  %p664_p1 = pneg %p843_p13  ;;  %s847_s27 = int_to_ptr.vmem [resolvable:$true] %s99_s27 }
  0x16   : > { %s667_s3 = scalar_lea.hbm %s1027_s0, 1536  ;;  %p668_p4 = scmp.lt.u32.totalorder %s841_s24, %s1027_s0 }
  0x17   : > { %p665_p2 = pnand %p664_p1, %p663_p0  ;;  %p669_p5 = scmp.lt.u32.totalorder %s667_s3, %s662_s29 }
  0x18   : > { %p671_p8 = scmp.lt.u32.totalorder %s662_s29, %s841_s24 }
  0x19   : > { %p666_p3 = pneg %p665_p2  ;;  %p670_p7 = por %p669_p5, %p668_p4 }
  0x1b   : > { %p672_p10 = por %p671_p8, %p670_p7 }
  0x1d   : > { %p673_p9 = pnand %p672_p10, %p666_p3 }
  0x1f   : > { %676 = shalt.err (!%p673_p9)
}
  0x20   : > { %s677_s11 = scalar_lea.vmem %s847_s27, 768  ;;  %s760_s13 = smov [#allocation3]  }
  0x21   : > { %p678_p0 = scmp.ne.s32.totalorder %s847_s27, %s677_s11  ;;  %s682_s14 = sshll.u32 %s760_s13, 4  ;;  %s683_s14 = int_to_ptr.vmem [resolvable:$false] %s682_s14 }
  0x22   : > { %s684_s19 = scalar_lea.vmem %s683_s14, 1536  ;;  %p685_p11 = scmp.lt.s32.totalorder %s847_s27, %s683_s14 }
  0x23   : > { %p680_p2 = pnand %p678_p0, %p664_p1  ;;  %p686_p4 = scmp.lt.s32.totalorder %s684_s19, %s677_s11 }
  0x25   : > { %p681_p12 = pneg %p680_p2  ;;  %p687_p5 = por %p686_p4, %p685_p11 }
  0x27   : > { %p688_p7 = pnand %p687_p5, %p681_p12 }
  0x29   : > { %691 = shalt.err (!%p688_p7)
}
  0x2a   : > { %s761_s20 = smov 128   ;;  %s762_s21 = smov 8  }
  0x2b   : > { %613 = dma.hbm_to_vmem [thread:$0]  (!%p843_p13), %s841_s24, 768, %s847_s27, %s849_s28, %s761_s20, %s761_s20, %s762_s21  }
  0x2c   : > { %p593_p9 = scmp.ge.s32.totalorder %s758_s9, 1  ;;  %p107_p1 = scmp.lt.s32.totalorder %s758_s9, 3 }
  0x2e   : > { %p108_p3 = pnand %p593_p9, %p107_p1 }
  0x2f   : > { %s880_s22 = sand.u32 (!%p108_p3), 1, %s750_s7  }
  0x30   : > { %111 = sbr.rel (%p108_p3) target bundleno = 389 (0x185), region = 24  ;;  %s114_s26 = scalar_lea.sflag (!%p108_p3), [#allocation4], %s880_s22 }
  0x31   : > { %s605_s23 = smul.u32 (!%p108_p3), 48, %s880_s22 }
  0x33   : > { %s117_s29 = scalar_lea.vmem (!%p108_p3), [#allocation3], %s605_s23 }
  0x37   : > { %737 = dma.done.wait (%p821_p6), %s114_s26, 768  }
  0x38   : > { %739 = vsyncadd (%p821_p6), %s114_s26, 4294966528  ;;  %vm138_vm0 = vcmask 162816   ;;  %vm141_vm1 = vcmask 158720   ;;  %v763_v0 = vmov 0.0   ;;  %v151_v1 = vld [vmem:[%s117_s29 + $0x10] sm:$0xff]  ;;  %v149_v2 = vld [vmem:[%s117_s29] sm:$0xff] }
  0x39   : > { %143 = vst.msk [vmem:[#allocation2 + $0x18] sm:$0xff] %vm138_vm0, %v763_v0  ;;  %144 = vst.msk [vmem:[#allocation2 + $0x20] sm:$0xff] %vm138_vm0, %v763_v0  ;;  %s764_s24 = smov 2   ;;  %v152_v3 = vld [vmem:[%s117_s29 + $0x18] sm:$0xff]  ;;  %v150_v4 = vld [vmem:[%s117_s29 + $0x8] sm:$0xff]  ;;  %vm179_vm2 = vcmask 146448  }
  0x3a   : > { %139 = vst.msk [vmem:[#allocation2] sm:$0xff] %vm138_vm0, %v763_v0  ;;  %140 = vst.msk [vmem:[#allocation2 + $0x8] sm:$0xff] %vm138_vm0, %v763_v0  ;;  %165 = vrot.lane.b32.xlu1 %v151_v1, %s764_s24  ;;  %161 = vrot.lane.b32.xlu0 %v149_v2, %s764_s24  ;;  %v154_v5 = vld [vmem:[%s117_s29 + $0x28] sm:$0xff]  ;;  %v153_v6 = vld [vmem:[%s117_s29 + $0x20] sm:$0xff]  ;;  %vm219_vm3 = vcmask 1046528   ;;  %vm265_vm4 = vcmask 1045504  }
  0x3b   : > { %146 = vst.msk [vmem:[#allocation2 + $0x30] sm:$0xff] %vm138_vm0, %v763_v0  ;;  %147 = vst.msk [vmem:[#allocation2 + $0x38] sm:$0xff] %vm138_vm0, %v763_v0  ;;  %vm293_vm5 = vcmask 1044480   ;;  %vm333_vm6 = vcmask 1043456   ;;  %s765_s16 = smov 127   ;;  %s766_s25 = smov 126  }
  0x3c   : > { %145 = vst.msk [vmem:[#allocation2 + $0x28] sm:$0xf] %vm141_vm1, %v763_v0  ;;  %142 = vst.msk [vmem:[#allocation2 + $0x10] sm:$0xf] %vm141_vm1, %v763_v0  ;;  %s767_s27 = smov 125   ;;  %s768_s28 = smov 124  }
  0x3d   : > { %148 = vst.msk [vmem:[#allocation2 + $0x40] sm:$0xf] %vm141_vm1, %v763_v0  ;;  %vm493_vm7 = vcmask 130048   ;;  %s962_s30 = scalar_lea.vmem [#allocation6], %s605_s23  ;;  %s603_s3 = smul.u32 768, %s803_s10 }
  0x3e   : > { %167 = vrot.lane.b32.xlu1 %v152_v3, %s764_s24  ;;  %163 = vrot.lane.b32.xlu0 %v150_v4, %s764_s24  ;;  %s515_s2 = sshll.u32 %s962_s30, 4  ;;  %s501_s13 = scalar_lea.sflag [#allocation5], %s880_s22  ;;  %s974_s2 = int_to_ptr.vmem [resolvable:$true] %s515_s2 }
  0x3f   : > { %s981_s11 = scalar_lea.hbm %s1028_s1, %s603_s3  ;;  %s692_s14 = scalar_lea.vmem %s974_s2, 768 }
  0x40   : > { %p693_p6 = scmp.ne.s32.totalorder %s974_s2, %s692_s14  ;;  %p1034_p11 = scmp.ne.s32.totalorder %s1031_s17, 0 }
  0x41   : > { %s769_s10 = smov [#allocation6]  }
  0x42   : > { %171 = vrot.lane.b32.xlu1 %v154_v5, %s764_s24  ;;  %169 = vrot.lane.b32.xlu0 %v153_v6, %s764_s24  ;;  %p694_p12 = pnand %p693_p6, %p1034_p11  ;;  %s696_s19 = sshll.u32 %s769_s10, 4  ;;  %s697_s19 = int_to_ptr.vmem [resolvable:$false] %s696_s19 }
  0x43   : > { %s698_s20 = scalar_lea.vmem %s697_s19, 1536  ;;  %p699_p8 = scmp.lt.s32.totalorder %s974_s2, %s697_s19 }
  0x44   : > { %p695_p13 = pneg %p694_p12  ;;  %p700_p10 = scmp.lt.s32.totalorder %s698_s20, %s692_s14 }
  0x46   : > { %p701_p0 = por %p700_p10, %p699_p8 }
  0x48   : > { %p702_p2 = pnand %p701_p0, %p695_p13 }
  0xac   : > { %v166_v7 = vpop.permute.xlu1 %165  ;;  %v162_v8 = vpop.permute.xlu0 %161 }
  0xad   : > { %182 = vst.msk [vmem:[#allocation2 + $0x1a] sm:$0xff] %vm179_vm2, %v166_v7  ;;  %180 = vst.msk [vmem:[#allocation2 + $0x2] sm:$0xff] %vm179_vm2, %v162_v8 }
  0xb0   : > { %v168_v9 = vpop.permute.xlu1 %167  ;;  %v164_v10 = vpop.permute.xlu0 %163 }
  0xb1   : > { %183 = vst.msk [vmem:[#allocation2 + $0x22] sm:$0xff] %vm179_vm2, %v168_v9  ;;  %181 = vst.msk [vmem:[#allocation2 + $0xa] sm:$0xff] %vm179_vm2, %v164_v10 }
  0xb4   : > { %v172_v11 = vpop.permute.xlu1 %171  ;;  %v170_v12 = vpop.permute.xlu0 %169  ;;  %v186_v13 = vld [vmem:[#allocation2] sm:$0xff]  ;;  %v189_v14 = vld [vmem:[#allocation2 + $0x18] sm:$0xff] }
  0xb5   : > { %185 = vst.msk [vmem:[#allocation2 + $0x3a] sm:$0xff] %vm179_vm2, %v172_v11  ;;  %184 = vst.msk [vmem:[#allocation2 + $0x32] sm:$0xff] %vm179_vm2, %v170_v12  ;;  %v195_v15 = vmul.f32 0.15246914, %v186_v13  ;;  %v201_v16 = vmul.f32 0.22184129, %v186_v13 }
  0xb6   : > { %v247_v17 = vmul.f32 0.25137913, %v186_v13  ;;  %v896_v18 = vmul.f32 0.22184129, %v189_v14  ;;  %v898_v19 = vmul.f32 0.25137913, %v189_v14 }
  0xb7   : > { %v220_v20 = vrot.slane %v201_v16, 1  ;;  %v294_v22 = vrot.slane %v201_v16, 3  ;;  %v900_v23 = vmul.f32 0.15246914, %v189_v14  ;;  %v334_v26 = vrot.slane %v195_v15, 4 }
  0xb8   : > { %v266_v21 = vrot.slane %v247_v17, 2  ;;  %v187_v24 = vld [vmem:[#allocation2 + $0x8] sm:$0xff]  ;;  %v188_v25 = vld [vmem:[#allocation2 + $0x10] sm:$0xf]  ;;  %v225_v27 = vrot.slane %v896_v18, 1  ;;  %v271_v28 = vrot.slane %v898_v19, 2 }
  0xb9   : > { %v196_v29 = vmul.f32 0.15246914, %v187_v24  ;;  %v202_v30 = vmul.f32 0.22184129, %v187_v24  ;;  %v203_v31 = vmul.f32 0.22184129, %v188_v25 }
  0xba   : > { %v248_v32 = vmul.f32 0.25137913, %v187_v24  ;;  %v249_v33 = vmul.f32 0.25137913, %v188_v25  ;;  %v321_v34 = vmul.f32 0.15246914, %v188_v25 }
  0xbb   : > { %v221_v35 = vrot.slane %v202_v30, 1  ;;  %v223_v36 = vrot.slane %v203_v31, 1  ;;  %v295_v37 = vrot.slane %v202_v30, 3  ;;  %v297_v38 = vrot.slane %v203_v31, 3  ;;  %v190_v43 = vld [vmem:[#allocation2 + $0x20] sm:$0xff] }
  0xbc   : > { %v267_v39 = vrot.slane %v248_v32, 2  ;;  %v269_v40 = vrot.slane %v249_v33, 2  ;;  %v335_v41 = vrot.slane %v196_v29, 4  ;;  %v337_v42 = vrot.slane %v321_v34, 4  ;;  %v191_v48 = vld [vmem:[#allocation2 + $0x28] sm:$0xf] }
  0xbd   : > { %v224_v44 = vsel %vm219_vm3, %v221_v35, %v223_v36  ;;  %v298_v45 = vsel %vm293_vm5, %v295_v37, %v297_v38  ;;  %v222_v46 = vsel %vm219_vm3, %v220_v20, %v221_v35  ;;  %v296_v47 = vsel %vm293_vm5, %v294_v22, %v295_v37  ;;  %v193_v17 = vld [vmem:[#allocation2 + $0x38] sm:$0xff]  ;;  %v194_v19 = vld [vmem:[#allocation2 + $0x40] sm:$0xf] }
  0xbe   : > { %v242_v49 = vadd.f32 %v224_v44, %v196_v29  ;;  %v270_v50 = vsel %vm265_vm4, %v267_v39, %v269_v40  ;;  %v338_v51 = vsel %vm333_vm6, %v335_v41, %v337_v42  ;;  %v241_v52 = vadd.f32 %v222_v46, %v195_v15  ;;  %v192_v46 = vld [vmem:[#allocation2 + $0x30] sm:$0xff] }
  0xbf   : > { %v268_v53 = vsel %vm265_vm4, %v266_v21, %v267_v39  ;;  %v336_v54 = vsel %vm333_vm6, %v334_v26, %v335_v41  ;;  %v198_v55 = vmul.f32 0.15246914, %v190_v43  ;;  %v205_v56 = vmul.f32 0.22184129, %v190_v43 }
  0xc0   : > { %v288_v57 = vadd.f32 %v270_v50, %v242_v49  ;;  %v287_v58 = vadd.f32 %v268_v53, %v241_v52  ;;  %v206_v59 = vmul.f32 0.22184129, %v191_v48  ;;  %v251_v60 = vmul.f32 0.25137913, %v190_v43 }
  0xc1   : > { %v226_v61 = vrot.slane %v205_v56, 1  ;;  %v252_v62 = vmul.f32 0.25137913, %v191_v48  ;;  %v300_v63 = vrot.slane %v205_v56, 3  ;;  %v322_v0 = vmul.f32 0.15246914, %v191_v48 }
  0xc2   : > { %v316_v1 = vadd.f32 %v298_v45, %v288_v57  ;;  %v315_v2 = vadd.f32 %v296_v47, %v287_v58  ;;  %v228_v3 = vrot.slane %v206_v59, 1  ;;  %v272_v4 = vrot.slane %v251_v60, 2 }
  0xc3   : > { %v274_v5 = vrot.slane %v252_v62, 2  ;;  %v302_v6 = vrot.slane %v206_v59, 3  ;;  %v340_v7 = vrot.slane %v198_v55, 4  ;;  %v342_v8 = vrot.slane %v322_v0, 4 }
  0xc4   : > { %v912_v9 = vadd.f32 %v338_v51, %v316_v1  ;;  %v914_v10 = vadd.f32 %v336_v54, %v315_v2  ;;  %v229_v11 = vsel %vm219_vm3, %v226_v61, %v228_v3  ;;  %v227_v12 = vsel %vm219_vm3, %v225_v27, %v226_v61 }
  0xc5   : > { %v244_v13 = vadd.f32 %v229_v11, %v198_v55  ;;  %v275_v14 = vsel %vm265_vm4, %v272_v4, %v274_v5  ;;  %v303_v15 = vsel %vm293_vm5, %v300_v63, %v302_v6  ;;  %v343_v16 = vsel %vm333_vm6, %v340_v7, %v342_v8 }
  0xc6   : > { %v922_v20 = vmul.f32 0.22184129, %v912_v9  ;;  %v925_v21 = vmul.f32 0.22184129, %v914_v10  ;;  %v243_v22 = vadd.f32 %v227_v12, %v900_v23  ;;  %v273_v24 = vsel %vm265_vm4, %v271_v28, %v272_v4 }
  0xc7   : > { %v290_v25 = vadd.f32 %v275_v14, %v244_v13  ;;  %v299_v26 = vrot.slane %v896_v18, 3  ;;  %v339_v27 = vrot.slane %v900_v23, 4  ;;  %v200_v29 = vmul.f32 0.15246914, %v193_v17 }
  0xc8   : > { %381 = vrot.lane.b32.xlu1 %v922_v20, %s765_s16  ;;  %379 = vrot.lane.b32.xlu0 %v925_v21, %s765_s16  ;;  %v289_v30 = vadd.f32 %v273_v24, %v243_v22  ;;  %v208_v31 = vmul.f32 0.22184129, %v193_v17  ;;  %v209_v32 = vmul.f32 0.22184129, %v194_v19  ;;  %v254_v33 = vmul.f32 0.25137913, %v193_v17 }
  0xc9   : > { %v318_v34 = vadd.f32 %v303_v15, %v290_v25  ;;  %v301_v28 = vsel %vm293_vm5, %v299_v26, %v300_v63  ;;  %v341_v35 = vsel %vm333_vm6, %v339_v27, %v340_v7  ;;  %v255_v18 = vmul.f32 0.25137913, %v194_v19 }
  0xca   : > { %v317_v36 = vadd.f32 %v301_v28, %v289_v30  ;;  %v231_v23 = vrot.slane %v208_v31, 1  ;;  %v233_v37 = vrot.slane %v209_v32, 1  ;;  %v277_v38 = vrot.slane %v254_v33, 2 }
  0xcb   : > { %v358_v39 = vadd.f32 %v343_v16, %v318_v34  ;;  %v279_v40 = vrot.slane %v255_v18, 2  ;;  %v305_v41 = vrot.slane %v208_v31, 3  ;;  %v307_v42 = vrot.slane %v209_v32, 3 }
  0xcc   : > { %v937_v43 = vadd.f32 %v341_v35, %v317_v36  ;;  %v234_v44 = vsel %vm219_vm3, %v231_v23, %v233_v37  ;;  %v323_v45 = vmul.f32 0.15246914, %v194_v19  ;;  %v345_v52 = vrot.slane %v200_v29, 4 }
  0xcd   : > { %v370_v47 = vmul.f32 0.22184129, %v358_v39  ;;  %v246_v48 = vadd.f32 %v234_v44, %v200_v29  ;;  %v280_v49 = vsel %vm265_vm4, %v277_v38, %v279_v40  ;;  %v308_v51 = vsel %vm293_vm5, %v305_v41, %v307_v42 }
  0xce   : > { %v369_v50 = vmul.f32 0.22184129, %v937_v43  ;;  %v347_v53 = vrot.slane %v323_v45, 4  ;;  %v207_v55 = vmul.f32 0.22184129, %v192_v46 }
  0xcf   : > { %385 = vrot.lane.b32.xlu1 %v370_v47, %s765_s16  ;;  %v292_v54 = vadd.f32 %v280_v49, %v246_v48  ;;  %v253_v56 = vmul.f32 0.25137913, %v192_v46  ;;  %v199_v57 = vmul.f32 0.15246914, %v192_v46  ;;  %v404_v11 = vmul.f32 0.25137913, %v912_v9 }
  0xd0   : > { %383 = vrot.lane.b32.xlu0 %v369_v50, %s765_s16  ;;  %v230_v59 = vrot.slane %v207_v55, 1  ;;  %v304_v61 = vrot.slane %v207_v55, 3  ;;  %v348_v62 = vsel %vm333_vm6, %v345_v52, %v347_v53  ;;  %v406_v14 = vmul.f32 0.25137913, %v358_v39 }
  0xd1   : > { %v320_v58 = vadd.f32 %v308_v51, %v292_v54  ;;  %v276_v60 = vrot.slane %v253_v56, 2  ;;  %v344_v5 = vrot.slane %v199_v57, 4  ;;  %v403_v15 = vmul.f32 0.25137913, %v914_v10 }
  0xd2   : > { %v232_v0 = vsel %vm219_vm3, %v230_v59, %v231_v23  ;;  %v306_v4 = vsel %vm293_vm5, %v304_v61, %v305_v41  ;;  %v405_v17 = vmul.f32 0.25137913, %v937_v43  ;;  %v362_v22 = vmul.f32 0.15246914, %v912_v9 }
  0xd3   : > { %v360_v63 = vadd.f32 %v348_v62, %v320_v58  ;;  %v278_v1 = vsel %vm265_vm4, %v276_v60, %v277_v38  ;;  %v245_v2 = vadd.f32 %v232_v0, %v199_v57  ;;  %v346_v8 = vsel %vm333_vm6, %v344_v5, %v345_v52 }
  0xd4   : > { %v364_v24 = vmul.f32 0.15246914, %v358_v39  ;;  %v361_v25 = vmul.f32 0.15246914, %v914_v10 }
  0xd5   : > { %v372_v3 = vmul.f32 0.22184129, %v360_v63  ;;  %v291_v6 = vadd.f32 %v278_v1, %v245_v2  ;;  %v408_v16 = vmul.f32 0.25137913, %v360_v63  ;;  %v366_v26 = vmul.f32 0.15246914, %v360_v63 }
  0xd7   : > { %389 = vrot.lane.b32.xlu1 %v372_v3, %s765_s16  ;;  %v319_v7 = vadd.f32 %v306_v4, %v291_v6 }
  0xd9   : > { %v359_v12 = vadd.f32 %v346_v8, %v319_v7 }
  0xdb   : > { %417 = vrot.lane.b32.xlu1 %v404_v11, %s766_s25  ;;  %v371_v13 = vmul.f32 0.22184129, %v359_v12  ;;  %v407_v19 = vmul.f32 0.25137913, %v359_v12  ;;  %v365_v27 = vmul.f32 0.15246914, %v359_v12 }
  0xdd   : > { %387 = vrot.lane.b32.xlu0 %v371_v13, %s765_s16 }
  0xdf   : > { %421 = vrot.lane.b32.xlu1 %v406_v14, %s766_s25 }
  0xe1   : > { %415 = vrot.lane.b32.xlu0 %v403_v15, %s766_s25 }
  0xe3   : > { %425 = vrot.lane.b32.xlu1 %v408_v16, %s766_s25 }
  0xe5   : > { %419 = vrot.lane.b32.xlu0 %v405_v17, %s766_s25 }
  0xe7   : > { %441 = vrot.lane.b32.xlu1 %v922_v20, %s767_s27  ;;  %v363_v20 = vmul.f32 0.15246914, %v937_v43 }
  0xe9   : > { %423 = vrot.lane.b32.xlu0 %v407_v19, %s766_s25 }
  0xeb   : > { %445 = vrot.lane.b32.xlu1 %v370_v47, %s767_s27 }
  0xed   : > { %439 = vrot.lane.b32.xlu0 %v925_v21, %s767_s27 }
  0xef   : > { %449 = vrot.lane.b32.xlu1 %v372_v3, %s767_s27 }
  0xf1   : > { %443 = vrot.lane.b32.xlu0 %v369_v50, %s767_s27 }
  0xf3   : > { %471 = vrot.lane.b32.xlu1 %v362_v22, %s768_s28 }
  0xf5   : > { %447 = vrot.lane.b32.xlu0 %v371_v13, %s767_s27 }
  0xf7   : > { %475 = vrot.lane.b32.xlu1 %v364_v24, %s768_s28 }
  0xf9   : > { %469 = vrot.lane.b32.xlu0 %v361_v25, %s768_s28 }
  0xfb   : > { %479 = vrot.lane.b32.xlu1 %v366_v26, %s768_s28 }
  0xfd   : > { %473 = vrot.lane.b32.xlu0 %v363_v20, %s768_s28 }
 0x101   : > { %477 = vrot.lane.b32.xlu0 %v365_v27, %s768_s28 }
 0x13a   : > { %v382_v21 = vpop.permute.xlu1 %381  ;;  %v380_v30 = vpop.permute.xlu0 %379 }
 0x13b   : > { %v398_v37 = vadd.f32 %v382_v21, %v362_v22  ;;  %v397_v47 = vadd.f32 %v380_v30, %v361_v25 }
 0x141   : > { %v386_v29 = vpop.permute.xlu1 %385 }
 0x142   : > { %v384_v31 = vpop.permute.xlu0 %383  ;;  %v400_v41 = vadd.f32 %v386_v29, %v364_v24 }
 0x143   : > { %v399_v55 = vadd.f32 %v384_v31, %v363_v20 }
 0x149   : > { %v390_v9 = vpop.permute.xlu1 %389 }
 0x14a   : > { %v402_v48 = vadd.f32 %v390_v9, %v366_v26 }
 0x14d   : > { %v418_v32 = vpop.permute.xlu1 %417 }
 0x14e   : > { %v434_v40 = vadd.f32 %v418_v32, %v398_v37 }
 0x14f   : > { %v388_v33 = vpop.permute.xlu0 %387 }
 0x150   : > { %v401_v63 = vadd.f32 %v388_v33, %v365_v27 }
 0x151   : > { %v422_v34 = vpop.permute.xlu1 %421 }
 0x152   : > { %v436_v45 = vadd.f32 %v422_v34, %v400_v41 }
 0x153   : > { %v416_v28 = vpop.permute.xlu0 %415 }
 0x154   : > { %v433_v51 = vadd.f32 %v416_v28, %v397_v47 }
 0x155   : > { %v426_v35 = vpop.permute.xlu1 %425 }
 0x156   : > { %v438_v53 = vadd.f32 %v426_v35, %v402_v48 }
 0x157   : > { %v420_v18 = vpop.permute.xlu0 %419 }
 0x158   : > { %v435_v59 = vadd.f32 %v420_v18, %v399_v55 }
 0x159   : > { %v442_v10 = vpop.permute.xlu1 %441 }
 0x15a   : > { %v458_v42 = vadd.f32 %v442_v10, %v434_v40 }
 0x15b   : > { %v424_v36 = vpop.permute.xlu0 %423 }
 0x15c   : > { %v437_v2 = vadd.f32 %v424_v36, %v401_v63 }
 0x15d   : > { %v446_v23 = vpop.permute.xlu1 %445 }
 0x15e   : > { %v460_v49 = vadd.f32 %v446_v23, %v436_v45 }
 0x15f   : > { %v440_v38 = vpop.permute.xlu0 %439 }
 0x160   : > { %v457_v56 = vadd.f32 %v440_v38, %v433_v51 }
 0x161   : > { %v450_v39 = vpop.permute.xlu1 %449 }
 0x162   : > { %v462_v57 = vadd.f32 %v450_v39, %v438_v53 }
 0x163   : > { %v444_v43 = vpop.permute.xlu0 %443 }
 0x164   : > { %v459_v0 = vadd.f32 %v444_v43, %v435_v59 }
 0x165   : > { %v472_v44 = vpop.permute.xlu1 %471 }
 0x166   : > { %v488_v46 = vadd.f32 %v472_v44, %v458_v42 }
 0x167   : > { %v448_v50 = vpop.permute.xlu0 %447 }
 0x168   : > { %495 = vst.msk [vmem:[%s962_s30 + $0x8] sm:$0xff] %vm493_vm7, %v488_v46  ;;  %v461_v4 = vadd.f32 %v448_v50, %v437_v2 }
 0x169   : > { %v476_v52 = vpop.permute.xlu1 %475 }
 0x16a   : > { %v490_v54 = vadd.f32 %v476_v52, %v460_v49 }
 0x16b   : > { %v470_v58 = vpop.permute.xlu0 %469 }
 0x16c   : > { %497 = vst.msk [vmem:[%s962_s30 + $0x18] sm:$0xff] %vm493_vm7, %v490_v54  ;;  %v487_v60 = vadd.f32 %v470_v58, %v457_v56 }
 0x16d   : > { %v480_v61 = vpop.permute.xlu1 %479 }
 0x16e   : > { %v492_v62 = vadd.f32 %v480_v61, %v462_v57  ;;  %494 = vst.msk [vmem:[%s962_s30] sm:$0xff] %vm493_vm7, %v487_v60 }
 0x16f   : > { %v474_v1 = vpop.permute.xlu0 %473 }
 0x170   : > { %499 = vst.msk [vmem:[%s962_s30 + $0x28] sm:$0xff] %vm493_vm7, %v492_v62  ;;  %v489_v3 = vadd.f32 %v474_v1, %v459_v0 }
 0x172   : > { %496 = vst.msk [vmem:[%s962_s30 + $0x10] sm:$0xff] %vm493_vm7, %v489_v3 }
 0x173   : > { %v478_v5 = vpop.permute.xlu0 %477 }
 0x174   : > { %v491_v6 = vadd.f32 %v478_v5, %v461_v4 }
 0x176   : > { %498 = vst.msk [vmem:[%s962_s30 + $0x20] sm:$0xff] %vm493_vm7, %v491_v6 }
 0x177   : > { %705 = shalt.err (!%p702_p2)
}
 0x178   : > { %s706_s21 = scalar_lea.hbm %s981_s11, 768  ;;  %s710_s29 = scalar_lea.hbm %s1028_s1, 1536 }
 0x179   : > { %p707_p4 = scmp.ne.s32.totalorder %s981_s11, %s706_s21  ;;  %p711_p9 = scmp.lt.u32.totalorder %s981_s11, %s1028_s1 }
 0x17a   : > { %p712_p1 = scmp.lt.u32.totalorder %s710_s29, %s706_s21  ;;  %p714_p6 = scmp.lt.u32.totalorder %s706_s21, %s981_s11 }
 0x17b   : > { %p708_p5 = pnand %p707_p4, %p1034_p11 }
 0x17c   : > { %p713_p3 = por %p712_p1, %p711_p9 }
 0x17d   : > { %p709_p7 = pneg %p708_p5 }
 0x17e   : > { %p715_p12 = por %p714_p6, %p713_p3 }
 0x180   : > { %p716_p13 = pnand %p715_p12, %p709_p7 }
 0x182   : > { %719 = shalt.err (!%p716_p13)
}
 0x183   : > { %s770_s25 = smov 128   ;;  %s771_s27 = smov 8  }
 0x184   : > { %608 = dma.vmem_to_hbm [thread:$0]  (%p1034_p11), %s974_s2, 768, %s981_s11, %s501_s13, %s770_s25, %s770_s25, %s771_s27  }
 0x185 PF: > { %s530_s28 = sand.u32 1, %s746_s6   ;;  %p1035_p8 = scmp.ne.s32.totalorder %s1032_s18, 0 }
 0x186   : > { %p1036_p10 = scmp.ge.s32.totalorder %s758_s9, 2  ;;  %s531_s30 = scalar_lea.sflag [#allocation5], %s530_s28 }
 0x188   : > { %p615_p0 = pnand %p1036_p10, %p1035_p8 }
 0x18a   : > { %741 = dma.done.wait (!%p615_p0), %s531_s30, 768  }
 0x18b   : > { %743 = vsyncadd (!%p615_p0), %s531_s30, 4294966528  ;;  %p14_p2 = scmp.ge.s32.totalorder %s807_s12, 4   ;;  %s1037_s6 = smov %s750_s7 }
 0x18c   : > { %s1038_s7 = smov %s754_s8  ;;  %s1039_s8 = smov %s819_s15 }
 0x18d   : > { %s1040_s9 = smov %s807_s12  ;;  %16 = sbr.rel (!%p14_p2) target bundleno = 5 (0x5), region = 69 }
 0x194   :  { %536 = vsyncpa [#allocation4], 1 }
 0x195   :  { %538 = vsyncpa [#allocation4 + $0x1], 1 }
 0x196   :  { %539 = vsyncpa [#allocation5], 1 }
 0x197   :  { %541 = vsyncpa [#allocation5 + $0x1], 1 }

</bundles_post_ra>
